<compile_context>
chip_gen: v5e
topology: v5e:2x2
jax: 0.10.0
libtpu: 0.0.40
codegen_flags: <defaults>
</compile_context>

<pallas_src>
import functools

import jax
import jax.numpy as jnp
from jax.experimental import pallas as pl
from jax.experimental.pallas import tpu as pltpu


# ----------------------------------------------------------------------------- kernel
def _squash_linear_kernel(ctx_ref, x_ref, wl_ref, bl_ref, wh_ref, bh_ref, out_ref):
    """Shared body for the 2-D and 3-D paths.

    ctx_ref : (1, ctx_dim)   [3-D path: per-batch row]  or (TB, ctx_dim) [2-D path]
    x_ref   : (TR, dim_in)   row tile (batch dim squeezed by BlockSpec in 3-D path)
    wl_ref  : (dim_in, TN)   resident parameter slice
    bl_ref  : (1, TN)
    wh_ref  : (ctx_dim, TN)
    bh_ref  : (1, TN)
    out_ref : (TR, TN)
    """
    # Gate: tiny matmul + sigmoid. Recomputed every tile -- MXU push is degenerate and
    # sigmoid rides the EUP slot, so it is free filler under the main matmul, and it
    # removes any carried state (all grid axes can be "parallel").
    gate = jax.nn.sigmoid(
        jnp.dot(ctx_ref[...], wh_ref[...], preferred_element_type=jnp.float32)
        + bh_ref[...].astype(jnp.float32)
    )
    # Main path: lane-dense 2-D matmul on the MXU, f32 accumulation, f32 epilogue.
    y = jnp.dot(x_ref[...], wl_ref[...], preferred_element_type=jnp.float32)
    y = y + bl_ref[...].astype(jnp.float32)
    out_ref[...] = (y * gate).astype(out_ref.dtype)


# ----------------------------------------------------------------------------- tiling
def _derive_row_tile(total_rows, dim_in, dim_out_tile, itemsize, budget_bytes=8 << 20):
    """Rows per step s.t. the double-buffered x+out tiles stay within budget_bytes.

    Budget of ~8 MiB keeps v5e comfortable while giving narrow features multi-k-row
    tiles (amortizes the ~0.35 us per-step overhead)."""
    align = max(8, 32 // itemsize)                       # 8 f32, 16 bf16, 32 int8
    per_row = 2 * (dim_in + dim_out_tile) * itemsize     # 2 buffers each of x and out
    t = budget_bytes // per_row
    t = (t // align) * align
    t = max(t, align)
    t = min(t, 4096)
    return total_rows if total_rows <= t else int(t)


def _derive_col_tile(dim_in, ctx_dim, dim_out, w_itemsize, budget_bytes=16 << 20):
    """dim_out tile so the (possibly double-buffered) parameter blocks fit VMEM.

    Keeps the same code path on v7x (64 MiB VMEM) for weights that fit v5e/v6e."""
    full_bytes = 2 * (dim_in + ctx_dim + 2) * dim_out * w_itemsize
    if dim_out <= 128 or full_bytes <= budget_bytes:
        return dim_out
    per_col = 2 * (dim_in + ctx_dim + 2) * w_itemsize
    tn = (budget_bytes // per_col) // 128 * 128
    return int(max(128, min(tn, dim_out)))


# ----------------------------------------------------------------------------- wrapper
def squash_linear(context, x, wl, bl, wh, bh):
    """
    context: (B, 1+dim_c)
    x:       (B, dim_in) or (B, S, dim_in)
    wl:      (dim_in, dim_out)    bl: (1, dim_out) or (dim_out,)
    wh:      (1+dim_c, dim_out)   bh: (1, dim_out) or (dim_out,)
    """
    dim_in, dim_out = wl.shape
    ctx_dim = wh.shape[0]
    bl = jnp.reshape(bl, (1, dim_out))
    bh = jnp.reshape(bh, (1, dim_out))

    # Pad the tiny hyper-path contraction (1+dim_c, typically 5) up to a sublane
    # multiple so the gate dot has an aligned K; the zero rows contribute nothing.
    # TODO(synk): hoist this (few-hundred-byte) pad to parameter-init time in prod.
    ctx_pad = (-ctx_dim) % 8
    if ctx_pad:
        context = jnp.pad(context, ((0, 0), (0, ctx_pad)))
        wh = jnp.pad(wh, ((0, ctx_pad), (0, 0)))
        ctx_dim += ctx_pad

    x_itemsize = jnp.dtype(x.dtype).itemsize
    w_itemsize = jnp.dtype(wl.dtype).itemsize

    TN = _derive_col_tile(dim_in, ctx_dim, dim_out, w_itemsize)
    num_n = pl.cdiv(dim_out, TN)
    # Parameter blocks have constant index along b/s; budget 2 buffers to be safe.
    w_tile_bytes = 2 * (dim_in + ctx_dim + 2) * TN * w_itemsize
    w_total_bytes = (dim_in + ctx_dim + 2) * dim_out * w_itemsize

    # ---------------------------- 3-D path: x is (B, S, dim_in) ----------------------------
    if x.ndim == 3:
        B, S, _ = x.shape
        TS = _derive_row_tile(S, dim_in, TN, x_itemsize)
        num_s = pl.cdiv(S, TS)
        ctx3 = context.reshape(B, 1, ctx_dim)   # keeps the (8,128) rule trivially legal

        vmem_bytes = int(
            2 * TS * (dim_in + TN) * x_itemsize      # double-buffered x + out tiles
            + w_tile_bytes                            # parameter blocks (x2 buffers)
            + 4 * ctx_dim * x_itemsize                # context row
            + (2 << 20)                               # headroom
        )
        vmem_bytes = min(max(vmem_bytes, 4 << 20), 48 << 20)

        cost = pl.CostEstimate(
            flops=2 * B * S * dim_in * dim_out + 2 * B * num_s * num_n * ctx_dim * TN,
            transcendentals=B * num_s * num_n * TN,
            bytes_accessed=(B * S * (dim_in + dim_out) * x_itemsize
                            + w_total_bytes + B * ctx_dim * x_itemsize),
        )

        return pl.pallas_call(
            _squash_linear_kernel,
            out_shape=jax.ShapeDtypeStruct((B, S, dim_out), x.dtype),
            grid_spec=pltpu.PrefetchScalarGridSpec(
                num_scalar_prefetch=0,
                # seq innermost: parameter blocks stay resident across the whole seq
                # sweep; x streams through HBM exactly num_n times (usually once).
                grid=(B, num_n, num_s),
                in_specs=[
                    # per-batch context row (batch dim squeezed -> kernel sees (1, ctx_dim))
                    pl.BlockSpec((None, 1, ctx_dim), lambda b, n, s: (b, 0, 0)),
                    # seq tile of x (batch dim squeezed -> kernel sees (TS, dim_in))
                    pl.BlockSpec((None, TS, dim_in), lambda b, n, s: (b, s, 0)),
                    # parameter slices: constant along b/s -> fetched once per n
                    pl.BlockSpec((dim_in, TN), lambda b, n, s: (0, n)),
                    pl.BlockSpec((1, TN), lambda b, n, s: (0, n)),
                    pl.BlockSpec((ctx_dim, TN), lambda b, n, s: (0, n)),
                    pl.BlockSpec((1, TN), lambda b, n, s: (0, n)),
                ],
                out_specs=pl.BlockSpec((None, TS, TN), lambda b, n, s: (b, s, n)),
            ),
            compiler_params=pltpu.CompilerParams(
                # No carried state anywhere -> every axis is parallel (v7x 2-TC / v6e
                # megacore can shard along S or dim_out even when B == 1).
                dimension_semantics=("parallel", "parallel", "parallel"),
                vmem_limit_bytes=vmem_bytes,
            ),
            cost_estimate=cost,
        )(ctx3, x, wl, bl, wh, bh)

    # ---------------------------- 2-D path: x is (B, dim_in) ----------------------------
    B = x.shape[0]
    TB = _derive_row_tile(B, dim_in, TN, x_itemsize)
    num_b = pl.cdiv(B, TB)

    vmem_bytes = int(
        2 * TB * (dim_in + TN + ctx_dim) * x_itemsize
        + w_tile_bytes
        + (2 << 20)
    )
    vmem_bytes = min(max(vmem_bytes, 4 << 20), 48 << 20)

    cost = pl.CostEstimate(
        flops=2 * B * dim_in * dim_out + 2 * B * num_n * ctx_dim * TN,
        transcendentals=B * num_n * TN,
        bytes_accessed=(B * (dim_in + dim_out + ctx_dim) * x_itemsize + w_total_bytes),
    )

    return pl.pallas_call(
        _squash_linear_kernel,
        out_shape=jax.ShapeDtypeStruct((B, dim_out), x.dtype),
        grid_spec=pltpu.PrefetchScalarGridSpec(
            num_scalar_prefetch=0,
            grid=(num_n, num_b),
            in_specs=[
                pl.BlockSpec((TB, ctx_dim), lambda n, i: (i, 0)),
                pl.BlockSpec((TB, dim_in), lambda n, i: (i, 0)),
                pl.BlockSpec((dim_in, TN), lambda n, i: (0, n)),
                pl.BlockSpec((1, TN), lambda n, i: (0, n)),
                pl.BlockSpec((ctx_dim, TN), lambda n, i: (0, n)),
                pl.BlockSpec((1, TN), lambda n, i: (0, n)),
            ],
            out_specs=pl.BlockSpec((TB, TN), lambda n, i: (i, n)),
        ),
        compiler_params=pltpu.CompilerParams(
            dimension_semantics=("parallel", "parallel"),
            vmem_limit_bytes=vmem_bytes,
        ),
        cost_estimate=cost,
    )(context, x, wl, bl, wh, bh)


# ----------------------------------------------------------------------------- reference
def _reference(context, x, wl, bl, wh, bh):
    gate = jax.nn.sigmoid(context @ wh + bl.reshape(1, -1) * 0 + bh.reshape(1, -1))
    y = x @ wl + bl.reshape(1, -1)
    if x.ndim == 3:
        gate = gate[:, None, :]
    return y * gate


if __name__ == "__main__":
    # SquashLinear(dim_in=32, dim_out=32, dim_c=4); x is (B=2, S=8, dim_in=32)
    dim_in, dim_out, dim_c = 32, 32, 4
    B, S = 2, 8

    key = jax.random.PRNGKey(0)
    k_ctx, k_x, k_wl, k_bl, k_wh, k_bh = jax.random.split(key, 6)

    context = jax.random.normal(k_ctx, (B, 1 + dim_c), dtype=jnp.float32)
    x = jax.random.normal(k_x, (B, S, dim_in), dtype=jnp.float32)

    # deterministic "torch-like" uniform(-1/sqrt(fan_in), 1/sqrt(fan_in)) init
    bl_lim = 1.0 / (dim_in ** 0.5)
    bh_lim = 1.0 / ((1 + dim_c) ** 0.5)
    wl = jax.random.uniform(k_wl, (dim_in, dim_out), jnp.float32, -bl_lim, bl_lim)
    bl = jax.random.uniform(k_bl, (1, dim_out), jnp.float32, -bl_lim, bl_lim)
    wh = jax.random.uniform(k_wh, (1 + dim_c, dim_out), jnp.float32, -bh_lim, bh_lim)
    bh = jax.random.uniform(k_bh, (1, dim_out), jnp.float32, -bh_lim, bh_lim)

    fn = jax.jit(functools.partial(squash_linear))

    # 3-D (seq) path
    out = jax.block_until_ready(fn(context, x, wl, bl, wh, bh))
    ref = _reference(context, x, wl, bl, wh, bh)
    assert out.shape == (B, S, dim_out), out.shape
    assert jnp.allclose(out, ref, atol=1e-5, rtol=1e-5), "3-D mismatch vs JAX reference"

    # 2-D (no seq axis) path
    x2d = x[:, 0, :]
    out2d = jax.block_until_ready(fn(context, x2d, wl, bl, wh, bh))
    ref2d = _reference(context, x2d, wl, bl, wh, bh)
    assert out2d.shape == (B, dim_out), out2d.shape
    assert jnp.allclose(out2d, ref2d, atol=1e-5, rtol=1e-5), "2-D mismatch vs JAX reference"

    print("KERNEL_OK")
</pallas_src>

<mosaic_0001>
module attributes {stable_mosaic.version = 11 : i64} {
  func.func @_squash_linear_kernel(%arg0: i32, %arg1: i32, %arg2: i32, %arg3: memref<1x1x8xf32, #tpu.memory_space<vmem>>, %arg4: memref<1x8x32xf32, #tpu.memory_space<vmem>>, %arg5: memref<32x32xf32, #tpu.memory_space<vmem>>, %arg6: memref<1x32xf32, #tpu.memory_space<vmem>>, %arg7: memref<8x32xf32, #tpu.memory_space<vmem>>, %arg8: memref<1x32xf32, #tpu.memory_space<vmem>>, %arg9: memref<1x8x32xf32, #tpu.memory_space<vmem>>) attributes {dimension_semantics = [#tpu.dimension_semantics<parallel>, #tpu.dimension_semantics<parallel>, #tpu.dimension_semantics<parallel>], iteration_bounds = array<i64: 2, 1, 1>, scalar_prefetch = 0 : i64, scratch_operands = 0 : i64, tpu.core_type = #tpu.core_type<tc>, window_params = [{transform_indices = @transform_0, window_bounds = array<i64: 1, 1, 8>}, {transform_indices = @transform_1, window_bounds = array<i64: 1, 8, 32>}, {transform_indices = @transform_2, window_bounds = array<i64: 32, 32>}, {transform_indices = @transform_3, window_bounds = array<i64: 1, 32>}, {transform_indices = @transform_4, window_bounds = array<i64: 8, 32>}, {transform_indices = @transform_5, window_bounds = array<i64: 1, 32>}, {transform_indices = @transform_6, window_bounds = array<i64: 1, 8, 32>}]} {
    %c0 = arith.constant 0 : index
    %c0_0 = arith.constant 0 : index
    %c0_1 = arith.constant 0 : index
    %0 = vector.load %arg3[%c0, %c0_0, %c0_1] : memref<1x1x8xf32, #tpu.memory_space<vmem>>, vector<1x1x8xf32>
    %1 = vector.shape_cast %0 : vector<1x1x8xf32> to vector<1x8xf32>
    %c0_2 = arith.constant 0 : index
    %c0_3 = arith.constant 0 : index
    %2 = vector.load %arg7[%c0_2, %c0_3] : memref<8x32xf32, #tpu.memory_space<vmem>>, vector<8x32xf32>
    %cst = arith.constant dense<0.000000e+00> : vector<1x32xf32>
    %3 = tpu.matmul %1, %2, %cst {dimension_numbers = #tpu.dot_dimension_numbers<[1], [0], [0], [1], [0, 0, 1, 1], [], []>} : vector<1x8xf32>, vector<8x32xf32>, vector<1x32xf32> -> vector<1x32xf32>
    %c0_4 = arith.constant 0 : index
    %c0_5 = arith.constant 0 : index
    %4 = vector.load %arg8[%c0_4, %c0_5] : memref<1x32xf32, #tpu.memory_space<vmem>>, vector<1x32xf32>
    %5 = arith.addf %3, %4 : vector<1x32xf32>
    %6 = arith.negf %5 : vector<1x32xf32>
    %7 = math.exp %6 : vector<1x32xf32>
    %cst_6 = arith.constant 1.000000e+00 : f32
    %8 = vector.broadcast %cst_6 : f32 to vector<1x32xf32>
    %9 = arith.addf %8, %7 : vector<1x32xf32>
    %10 = arith.divf %8, %9 : vector<1x32xf32>
    %c0_7 = arith.constant 0 : index
    %c0_8 = arith.constant 0 : index
    %c0_9 = arith.constant 0 : index
    %11 = vector.load %arg4[%c0_7, %c0_8, %c0_9] : memref<1x8x32xf32, #tpu.memory_space<vmem>>, vector<1x8x32xf32>
    %12 = vector.shape_cast %11 : vector<1x8x32xf32> to vector<8x32xf32>
    %c0_10 = arith.constant 0 : index
    %c0_11 = arith.constant 0 : index
    %13 = vector.load %arg5[%c0_10, %c0_11] : memref<32x32xf32, #tpu.memory_space<vmem>>, vector<32x32xf32>
    %cst_12 = arith.constant dense<0.000000e+00> : vector<8x32xf32>
    %14 = tpu.matmul %12, %13, %cst_12 {dimension_numbers = #tpu.dot_dimension_numbers<[1], [0], [0], [1], [0, 0, 1, 1], [], []>} : vector<8x32xf32>, vector<32x32xf32>, vector<8x32xf32> -> vector<8x32xf32>
    %c0_13 = arith.constant 0 : index
    %c0_14 = arith.constant 0 : index
    %15 = vector.load %arg6[%c0_13, %c0_14] : memref<1x32xf32, #tpu.memory_space<vmem>>, vector<1x32xf32>
    %16 = vector.broadcast %15 : vector<1x32xf32> to vector<8x32xf32>
    %17 = arith.addf %14, %16 : vector<8x32xf32>
    %18 = vector.broadcast %10 : vector<1x32xf32> to vector<8x32xf32>
    %19 = arith.mulf %17, %18 : vector<8x32xf32>
    %c0_15 = arith.constant 0 : index
    %c0_16 = arith.constant 0 : index
    %c0_17 = arith.constant 0 : index
    %20 = vector.load %arg9[%c0_15, %c0_16, %c0_17] : memref<1x8x32xf32, #tpu.memory_space<vmem>>, vector<1x8x32xf32>
    %21 = vector.shape_cast %20 : vector<1x8x32xf32> to vector<8x32xf32>
    %22 = vector.shape_cast %19 : vector<8x32xf32> to vector<1x8x32xf32>
    tpu.vector_store %arg9[%c0_15, %c0_16, %c0_17], %22 {strides = array<i32>} : memref<1x8x32xf32, #tpu.memory_space<vmem>>, vector<1x8x32xf32>,
    return
  }
  func.func @transform_0(%arg0: i32, %arg1: i32, %arg2: i32) -> (i32, i32, i32) {
    %c0_i32 = arith.constant 0 : i32
    %c0_i32_0 = arith.constant 0 : i32
    %c0_i32_1 = arith.constant 0 : i32
    return %arg0, %c0_i32, %c0_i32_0 : i32, i32, i32
  }
  func.func @transform_1(%arg0: i32, %arg1: i32, %arg2: i32) -> (i32, i32, i32) {
    %c0_i32 = arith.constant 0 : i32
    %c0_i32_0 = arith.constant 0 : i32
    return %arg0, %arg2, %c0_i32 : i32, i32, i32
  }
  func.func @transform_2(%arg0: i32, %arg1: i32, %arg2: i32) -> (i32, i32) {
    %c0_i32 = arith.constant 0 : i32
    %c0_i32_0 = arith.constant 0 : i32
    return %c0_i32, %arg1 : i32, i32
  }
  func.func @transform_3(%arg0: i32, %arg1: i32, %arg2: i32) -> (i32, i32) {
    %c0_i32 = arith.constant 0 : i32
    %c0_i32_0 = arith.constant 0 : i32
    return %c0_i32, %arg1 : i32, i32
  }
  func.func @transform_4(%arg0: i32, %arg1: i32, %arg2: i32) -> (i32, i32) {
    %c0_i32 = arith.constant 0 : i32
    %c0_i32_0 = arith.constant 0 : i32
    return %c0_i32, %arg1 : i32, i32
  }
  func.func @transform_5(%arg0: i32, %arg1: i32, %arg2: i32) -> (i32, i32) {
    %c0_i32 = arith.constant 0 : i32
    %c0_i32_0 = arith.constant 0 : i32
    return %c0_i32, %arg1 : i32, i32
  }
  func.func @transform_6(%arg0: i32, %arg1: i32, %arg2: i32) -> (i32, i32, i32) {
    %c0_i32 = arith.constant 0 : i32
    return %arg0, %arg2, %arg1 : i32, i32, i32
  }
}

</mosaic_0001>

<bundles_post_ra>
// kernel: squash_linear.1
= control target key start
LH: loop header
LB: loop body
LE: loop exit
PB: predicated region body
PF: predicated region fallthrough
CT: control target
= control target key end

     0   :  { %11 = vsyncpa [#allocation3], 0  ;;  %s959_s0 = inlined_call_operand.vmem [shape: f32[2,1,8], index: 0, kind: input, shape index: {}]   ;;  %s960_s1 = inlined_call_operand.vmem [shape: f32[2,8,32], index: 1, kind: input, shape index: {}]   ;;  %s961_s2 = inlined_call_operand.hbm [shape: f32[32,32], index: 2, kind: input, shape index: {}]   ;;  %s962_s3 = inlined_call_operand.vmem [shape: f32[1,32], index: 3, kind: input, shape index: {}]   ;;  %s963_s4 = inlined_call_operand.vmem [shape: f32[8,32], index: 4, kind: input, shape index: {}]   ;;  %s964_s5 = inlined_call_operand.vmem [shape: f32[1,32], index: 5, kind: input, shape index: {}]   ;;  %s965_s6 = inlined_call_operand.hbm [shape: f32[2,8,32], index: 6, kind: output, shape index: {}]  }
   0x1   :  { %12 = vsyncpa [#allocation4], 0 }
   0x2   :  { %14 = vsyncpa [#allocation4 + $0x1], 0  ;;  %s845_s21 = smov 0   ;;  %s847_s22 = smov 0  }
   0x3   :  { %s849_s23 = smov 0   ;;  %s851_s24 = smov 0  }
   0x4   :  { %s853_s25 = smov 0   ;;  %s855_s26 = smov 0  }
   0x5 LB: > { %s601_s27 = sadd.s32 4294967295, %s805_s26   ;;  %s602_s28 = sadd.s32 4294967294, %s805_s26   ;;  %s805_s26 = sphi %s855_s26, %s20_s26   ;;  %s801_s25 = sphi %s853_s25, %s972_s25   ;;  %s797_s24 = sphi %s851_s24, %s971_s24   ;;  %s793_s23 = sphi %s849_s23, %s970_s23   ;;  %s789_s22 = sphi %s847_s22, %s969_s22   ;;  %s785_s21 = sphi %s845_s21, %s968_s21  }
   0x6   : > { %s39_s29 = sadd.s32 1, %s801_s25  ;;  %s208_s30 = sadd.s32 1, %s793_s23 }
   0x7   : > { %p41_p0 = scmp.ge.s32.totalorder %s39_s29, 2  ;;  %p218_p1 = scmp.ne.s32.totalorder %s793_s23, %s789_s22 }
   0x8   : > { %p219_p2 = scmp.eq.s32.totalorder %s601_s27, 1  ;;  %p224_p3 = scmp.ne.s32.totalorder %s789_s22, %s785_s21 }
   0x9   : > { %s974_s29 = smov (%p41_p0, %s39_s29), 0  ;;  %p225_p5 = scmp.eq.s32.totalorder %s602_s28, 1 }
   0xa   : > { %p885_p4 = por %p219_p2, %p218_p1  ;;  %s201_s8 = ssub.s32 %s801_s25, %s974_s29 }
   0xb   : > { %p603_p6 = scmp.ge.s32.totalorder %s805_s26, 1  ;;  %p206_p7 = scmp.eq.s32.totalorder %s201_s8, 0 }
   0xc   : > { %p892_p8 = por %p225_p5, %p224_p3  ;;  %p232_p9 = scmp.lt.s32.totalorder %s805_s26, 3 }
   0xd   : > { %s898_s10 = scalar_select %p206_p7, %s793_s23, %s208_s30  }
   0xe   : > { %p233_p10 = pnand %p603_p6, %p232_p9  ;;  %p634_p11 = scmp.eq.s32.totalorder %s601_s27, 0 }
   0xf   : > { %s245_s13 = sshll.u32 %s961_s2, 4  ;;  %s807_s14 = smov [#allocation2]   ;;  %s246_s13 = int_to_ptr.hbm [resolvable:$true] %s245_s13 }
  0x10   : > { %p626_p12 = pneg %p233_p10  ;;  %s247_s15 = sshll.u32 %s807_s14, 4  ;;  %s248_s15 = int_to_ptr.vmem [resolvable:$true] %s247_s15 }
  0x11   : > { %s808_s16 = smov 128   ;;  %s809_s17 = smov 8  }
  0x12   : > { %p627_p13 = pnand %p634_p11, %p626_p12  ;;  %298 = sbr.rel (%p233_p10) target bundleno = 193 (0xc1), region = 44 }
  0x14   : > { %629 = dma.hbm_to_vmem [thread:$0]  (!%p627_p13), %s246_s13, 512, %s248_s15, [#allocation3], %s808_s16, %s808_s16, %s809_s17  }
  0x17   : > { %776 = dma.done.wait (%p634_p11), [#allocation3], 512  }
  0x18   : > { %778 = vsyncadd (%p634_p11), [#allocation3], 4294966784  ;;  %p344_p0 = scmp.lt.s32.totalorder %s797_s24, 1  ;;  %vm367_vm0 = vcmask 64512   ;;  %v365_v0 = vld [vmem:[%s963_s4] sm:$0xff]  ;;  %v413_v3 = vld [vmem:[#allocation2 + $0x10] sm:$0xff] }
  0x19   : > { %v414_v2 = vld [vmem:[#allocation2 + $0x18] sm:$0xff]  ;;  %386 = vmatpush.msra.mxu0 %v365_v0  ;;  %v412_v4 = vld [vmem:[#allocation2 + $0x8] sm:$0xff]  ;;  %v411_v5 = vld [vmem:[#allocation2] sm:$0xff]  ;;  %vm419_vm1 = vcmask 261120   ;;  %s341_s16 = sand.u32 1, %s789_s22  }
  0x1a   : > { %s345_s18 = scalar_select %p344_p0, %s797_s24, 1  ;;  %435 = vmatpush.msra.mxu1 %v414_v2  ;;  %v366_v7 = vld [vmem:[%s964_s5] sm:$0x1] }
  0x1b   : > { %s611_s17 = sshll.u32 %s341_s16, 3  ;;  %v688_v19 = vld [vmem:[%s962_s3] ss:$0 sm:$0xff]  ;;  %s447_s12 = scalar_lea.sflag [#allocation4], %s341_s16 }
  0x1c   : > { %s346_s27 = scalar_lea.vmem %s959_s0, %s345_s18  ;;  %s612_s28 = sshll.u32 %s345_s18, 3  ;;  %436 = vmatpush.msra.mxu1 %v413_v3 }
  0x1d   : > { %v364_v1 = vld [vmem:[%s346_s27] sm:$0x1]  ;;  %s353_s13 = scalar_lea.vmem %s960_s1, %s612_s28  ;;  %s617_s18 = sshll.u32 %s797_s24, 3 }
  0x1e   : > { %613 = vmatmul.msk.f32.vlgmr.msra.gmra.mxu0 %vm367_vm0, %v364_v1  ;;  %437 = vmatpush.msra.mxu1 %v412_v4  ;;  %v410_v6 = vld [vmem:[%s353_s13] sm:$0xff]  ;;  %s459_s30 = scalar_lea.hbm %s965_s6, %s617_s18  ;;  %s343_s24 = scalar_lea.vmem [#allocation5], %s611_s17 }
  0x1f   : > { %s461_s8 = sshll.u32 %s343_s24, 4  ;;  %s463_s11 = sshll.u32 %s459_s30, 4  ;;  %s462_s8 = int_to_ptr.vmem [resolvable:$true] %s461_s8  ;;  %s464_s11 = int_to_ptr.hbm [resolvable:$true] %s463_s11 }
  0x20   : > { %438 = vmatpush.msra.mxu1 %v411_v5  ;;  %s737_s13 = sshra.s32 %s464_s11, 4  ;;  %s743_s17 = scalar_lea.hbm %s965_s6, 16  ;;  %s738_s13 = int_to_ptr.hbm [resolvable:$true] %s737_s13 }
  0x21   : > { %615 = vmatmul.msk.f32.vlgmr.msra.gmra.mxu1 %vm419_vm1, %v410_v6  ;;  %s739_s14 = scalar_lea.hbm %s738_s13, 8  ;;  %p744_p5 = scmp.lt.s32.totalorder %s738_s13, %s965_s6 }
  0x22   : > { %p740_p1 = scmp.ne.s32.totalorder %s738_s13, %s739_s14  ;;  %p745_p6 = scmp.lt.s32.totalorder %s743_s17, %s739_s14 }
  0x24   : > { %p741_p2 = pnand %p740_p1, %p885_p4  ;;  %p746_p7 = por %p745_p6, %p744_p5 }
  0x26   : > { %p742_p3 = pneg %p741_p2 }
  0x28   : > { %p747_p9 = pnand %p746_p7, %p742_p3 }
  0x9b   : > { %v388_v8 = vpop.f32.mrf.mxu0 }
  0x9c   : > { %v389_v9 = vadd.f32 %v388_v8, %v366_v7 }
  0x9e   : > { %v614_v10 = vmul.f32 -1.442695, %v389_v9  ;;  %v440_v20 = vpop.f32.mrf.mxu1 }
  0x9f   : > { %v441_v24 = vadd.f32 %v688_v19, %v440_v20 }
  0xa0   : > { %689 = vpow2.f32 %v614_v10 }
  0xa6   : > { %v690_v11 = vpop.eup %689 }
  0xa7   : > { %v394_v12 = vadd.f32 1.0, %v690_v11 }
  0xa9   : > { %691 = vrcp.f32 %v394_v12  ;;  %v406_v16 = vand.u32 2147483648, %v394_v12  ;;  %v404_v18 = vand.u32 2147483647, %v394_v12  ;;  %vm400_vm3 = vweird.f32 %v394_v12 }
  0xab   : > { %v407_v22 = vor.u32 1.1754944e-38, %v406_v16  ;;  %vm405_vm5 = vcmp.eq.f32.partialorder %v404_v18, 8.507059e+37 }
  0xaf   : > { %v692_v13 = vpop.eup %691 }
  0xb0   : > { %v396_v14 = vmul.f32 %v692_v13, %v394_v12  ;;  %vm401_vm2 = vweird.f32 %v692_v13 }
  0xb1   : > { %vm402_vm4 = vmor %vm400_vm3, %vm401_vm2 }
  0xb2   : > { %v397_v15 = vsub.f32 1.0, %v396_v14 }
  0xb4   : > { %v398_v17 = vmul.f32 %v692_v13, %v397_v15 }
  0xb6   : > { %v399_v21 = vadd.f32 %v692_v13, %v398_v17 }
  0xb8   : > { %v403_v23 = vsel %vm402_vm4, %v692_v13, %v399_v21 }
  0xb9   : > { %v408_v25 = vsel %vm405_vm5, %v407_v22, %v403_v23 }
  0xba   : > { %v443_v26 = vperm.slane %v408_v25, 0 }
  0xbc   : > { %v444_v27 = vmul.f32 %v443_v26, %v441_v24 }
  0xbe   : > { %445 = vst.msk [vmem:[%s343_s24] sm:$0xff] %vm419_vm1, %v444_v27 }
  0xbf   : > { %750 = shalt.err (!%p747_p9)
}
  0xc0   : > { %624 = dma.vmem_to_hbm [thread:$0]  (%p885_p4), %s462_s8, 128, %s464_s11, %s447_s12  }
  0xc1 PF: > { %p636_p10 = scmp.ge.s32.totalorder %s805_s26, 2  ;;  %s475_s16 = sand.u32 1, %s785_s21  }
  0xc2   : > { %s476_s27 = scalar_lea.sflag [#allocation4], %s475_s16 }
  0xc3   : > { %p631_p11 = pnand %p636_p10, %p892_p8 }
  0xc5   : > { %p632_p12 = pneg %p631_p11 }
  0xc7   : > { %780 = dma.done.wait (%p632_p12), %s476_s27, 128  }
  0xc8   : > { %782 = vsyncadd (%p632_p12), %s476_s27, 4294967168  ;;  %s20_s26 = sadd.s32 1, %s805_s26   ;;  %s968_s21 = smov %s789_s22 }
  0xc9   : > { %p17_p13 = scmp.ge.s32.totalorder %s20_s26, 4   ;;  %s969_s22 = smov %s793_s23 }
  0xca   : > { %s970_s23 = smov %s898_s10  ;;  %s971_s24 = smov %s801_s25 }
  0xcb   : > { %s972_s25 = smov %s974_s29  ;;  %19 = sbr.rel (!%p17_p13) target bundleno = 5 (0x5), region = 97 }
  0xd0   :  { %482 = vsyncpa [#allocation3], 1 }
  0xd1   :  { %484 = vsyncpa [#allocation3 + $0x1], 1 }
  0xd2   :  { %485 = vsyncpa [#allocation4], 1 }
  0xd3   :  { %487 = vsyncpa [#allocation4 + $0x1], 1 }

</bundles_post_ra>
